<compile_context>
chip_gen: v7x
topology: tpu7x:2x2x1
jax: 0.10.0
libtpu: 0.0.40
codegen_flags: <defaults>
</compile_context>

<pallas_src>
import functools

import jax
import jax.numpy as jnp
from jax.experimental import pallas as pl
from jax.experimental.pallas import tpu as pltpu


# -----------------------------------------------------------------------------
# Kernel 1: streaming max / sum pooling over the spatial (lane) axis.
# -----------------------------------------------------------------------------
def _pool_kernel(x_ref, max_ref, sum_ref, *, hw, thw, has_partial):
    j = pl.program_id(1)  # spatial-tile index (innermost, "arbitrary")

    @pl.when(j == 0)
    def _init():
        max_ref[...] = jnp.full(max_ref.shape, -jnp.inf, jnp.float32)
        sum_ref[...] = jnp.zeros(sum_ref.shape, jnp.float32)

    x = x_ref[...]  # (TN, THW), bf16 (or f32)

    def _accumulate(x_for_max, x_for_sum):
        # Max reduce in the streaming dtype (exact for bf16), accumulate in f32.
        tile_max = jnp.max(x_for_max, axis=-1, keepdims=True).astype(jnp.float32)
        tile_sum = jnp.sum(x_for_sum.astype(jnp.float32), axis=-1, keepdims=True)
        max_ref[...] = jnp.maximum(max_ref[...], tile_max)
        sum_ref[...] = sum_ref[...] + tile_sum

    if has_partial:
        # Masking is gated so the hot (full-tile) path never pays for it.
        last = pl.num_programs(1) - 1

        @pl.when(j != last)
        def _full_tile():
            _accumulate(x, x)

        @pl.when(j == last)
        def _masked_tile():
            # Lane-only iota -> (1, THW) mask, broadcast inside the selects.
            lane = jax.lax.broadcasted_iota(jnp.int32, (1, thw), 1)
            valid = (j * thw + lane) < hw
            neg_inf = jnp.asarray(-jnp.inf, dtype=x.dtype)
            zero = jnp.asarray(0.0, dtype=x.dtype)
            _accumulate(jnp.where(valid, x, neg_inf), jnp.where(valid, x, zero))
    else:
        _accumulate(x, x)


# -----------------------------------------------------------------------------
# Kernel 2: tiny MLP + sigmoid on the pooled features (one shot, all in VMEM).
# -----------------------------------------------------------------------------
def _mlp_kernel(xmax_ref, xsum_ref, w1max_ref, w1avg_ref, b1_ref,
                w2sum_ref, b2sum_ref, o_ref, *, inv_hw):
    x_max = xmax_ref[...]                 # (B, C) f32
    x_avg = xsum_ref[...] * inv_hw        # mean over the TRUE spatial extent
    # Linear(2C -> hidden) on the implicit concat [max, avg]:
    #   [max, avg] @ W1 == max @ W1[:C] + avg @ W1[C:]
    h = (
        jnp.dot(x_max, w1max_ref[...], preferred_element_type=jnp.float32)
        + jnp.dot(x_avg, w1avg_ref[...], preferred_element_type=jnp.float32)
        + b1_ref[...]
    )
    h = jnp.maximum(h, 0.0)  # ReLU
    # chunk(y, 2, dim=1) + add folded into W2_sum / b2_sum at trace time.
    y = jnp.dot(h, w2sum_ref[...], preferred_element_type=jnp.float32) + b2sum_ref[...]
    o_ref[...] = jax.nn.sigmoid(y).astype(o_ref.dtype)


# -----------------------------------------------------------------------------
# Wrapper
# -----------------------------------------------------------------------------
def channel_attention(x, w1, b1, w2, b2, *,
                      input_dtype=jnp.bfloat16,
                      x_tile_budget_bytes=6 * 1024 * 1024):
    """CBAM ChannelAttention forward.

    x : (B, C, H, W)
    w1: (2C, hidden)  -- transpose of torch Linear(2C, hidden).weight
    b1: (hidden,)
    w2: (hidden, 2C)  -- transpose of torch Linear(hidden, 2C).weight
    b2: (2C,)
    returns: (B, C, 1, 1) attention weights (float32).
    """
    B, C, H, W = x.shape
    HW = H * W
    N = B * C
    two_c, hidden = w1.shape
    assert two_c == 2 * C

    # ---- trace-time parameter folding (no in-kernel slicing) ----------------
    w1_max = w1[:C, :]
    w1_avg = w1[C:, :]
    w2_sum = w2[:, :C] + w2[:, C:]
    b1_2d = b1.reshape(1, hidden)
    b2_sum = (b2[:C] + b2[C:]).reshape(1, C)

    # ---- streaming input layout: (B*C, HW) in bf16 ---------------------------
    x2 = x.reshape(N, HW)
    if input_dtype is not None:
        x2 = x2.astype(input_dtype)  # halves HBM traffic; accumulation stays f32
    elem = x2.dtype.itemsize
    row_q = max(8, 32 // elem)       # sublane quantum: 8 (f32) / 16 (bf16)

    # ---- tile selection ------------------------------------------------------
    budget = x_tile_budget_bytes
    if N <= row_q:
        # Tiny row count: one row tile (megacore can't be fed here anyway).
        TN = N
        lane_budget = max(128, (budget // max(1, TN * elem)) // 128 * 128)
        THW = min(HW, lane_budget)
    elif HW * row_q * elem <= budget:
        # Spatial fits in one tile: go spatially full, split rows evenly into
        # >= 2 tiles so the "parallel" axis keeps both v7x TensorCores busy.
        THW = HW
        rows_budget = max(row_q, (budget // (HW * elem)) // row_q * row_q)
        n_rt = max(2, pl.cdiv(N, rows_budget))
        TN = max(row_q, pl.cdiv(pl.cdiv(N, n_rt), row_q) * row_q)
        TN = min(TN, rows_budget)
    else:
        # Large spatial extent: minimum row height, lane tile fills the budget.
        TN = row_q
        lane_budget = max(128, (budget // (TN * elem)) // 128 * 128)
        THW = min(HW, lane_budget)

    has_partial = (HW % THW) != 0
    grid = (pl.cdiv(N, TN), pl.cdiv(HW, THW))

    pooled_max, pooled_sum = pl.pallas_call(
        functools.partial(_pool_kernel, hw=HW, thw=THW, has_partial=has_partial),
        out_shape=(
            jax.ShapeDtypeStruct((N, 1), jnp.float32),
            jax.ShapeDtypeStruct((N, 1), jnp.float32),
        ),
        grid_spec=pltpu.PrefetchScalarGridSpec(
            num_scalar_prefetch=0,
            grid=grid,
            in_specs=[
                # x: tiled over (row tile, spatial tile); default double-buffered.
                pl.BlockSpec((TN, THW), lambda i, j: (i, j)),
            ],
            out_specs=(
                # Running max / running sum live in the output blocks,
                # revisited across the inner "arbitrary" spatial axis.
                pl.BlockSpec((TN, 1), lambda i, j: (i, 0)),
                pl.BlockSpec((TN, 1), lambda i, j: (i, 0)),
            ),
        ),
        compiler_params=pltpu.CompilerParams(
            dimension_semantics=("parallel", "arbitrary"),
            vmem_limit_bytes=32 * 1024 * 1024,
        ),
    )(x2)

    x_max = pooled_max.reshape(B, C)
    x_sum = pooled_sum.reshape(B, C)

    # One-shot micro-kernel: whole arrays fit trivially in VMEM.
    attn = pl.pallas_call(
        functools.partial(_mlp_kernel, inv_hw=1.0 / HW),
        out_shape=jax.ShapeDtypeStruct((B, C), jnp.float32),
    )(x_max, x_sum, w1_max, w1_avg, b1_2d, w2_sum, b2_sum)

    return attn.reshape(B, C, 1, 1)


# -----------------------------------------------------------------------------
# Pure-JAX reference mirroring the PyTorch forward.
# -----------------------------------------------------------------------------
def _reference(x, w1, b1, w2, b2):
    B, C, H, W = x.shape
    x_max = jnp.max(x.reshape(B, C, -1), axis=-1)
    x_avg = jnp.mean(x.reshape(B, C, -1), axis=-1)
    feat = jnp.concatenate([x_max, x_avg], axis=1)  # (B, 2C)
    h = jnp.maximum(feat @ w1 + b1, 0.0)
    y = h @ w2 + b2
    y_max, y_avg = y[:, :C], y[:, C:]
    return jax.nn.sigmoid(y_max + y_avg).reshape(B, C, 1, 1)


def _make_params(key, C, ratio):
    hidden = 2 * C // ratio
    kw1, kb1, kw2, kb2 = jax.random.split(key, 4)
    bound1 = 1.0 / (2 * C) ** 0.5
    w1 = jax.random.uniform(kw1, (2 * C, hidden), jnp.float32, -bound1, bound1)
    b1 = jax.random.uniform(kb1, (hidden,), jnp.float32, -bound1, bound1)
    bound2 = 1.0 / hidden ** 0.5
    w2 = jax.random.uniform(kw2, (hidden, 2 * C), jnp.float32, -bound2, bound2)
    b2 = jax.random.uniform(kb2, (2 * C,), jnp.float32, -bound2, bound2)
    return w1, b1, w2, b2


def _check(key, B, C, H, W, ratio, **kw):
    kx, kp = jax.random.split(key)
    x = jax.random.normal(kx, (B, C, H, W), dtype=jnp.float32)
    w1, b1, w2, b2 = _make_params(kp, C, ratio)

    out = jax.block_until_ready(channel_attention(x, w1, b1, w2, b2, **kw))
    assert out.shape == (B, C, 1, 1)

    # Tight check against a reference fed the same bf16-rounded input
    # (the kernel streams x as bf16; all accumulation is f32).
    x_bf16 = x.astype(jnp.bfloat16).astype(jnp.float32)
    ref_bf16 = _reference(x_bf16, w1, b1, w2, b2)
    assert jnp.allclose(out, ref_bf16, atol=1e-4, rtol=1e-4), (
        jnp.max(jnp.abs(out - ref_bf16)))
    # Loose check against the exact f32 reference (bf16 input quantization).
    ref_f32 = _reference(x, w1, b1, w2, b2)
    assert jnp.allclose(out, ref_f32, atol=2e-2, rtol=2e-2), (
        jnp.max(jnp.abs(out - ref_f32)))


if __name__ == "__main__":
    key = jax.random.PRNGKey(0)
    k1, k2 = jax.random.split(key)

    # Module demo shape: B=2, C=4, 16x16 spatial, reduction ratio 2.
    _check(k1, B=2, C=4, H=16, W=16, ratio=2)

    # Second config exercising multi row-tile, multi spatial-tile and the
    # (gated) partial-tile masking path via a tiny artificial tile budget.
    _check(k2, B=8, C=4, H=20, W=20, ratio=2, x_tile_budget_bytes=8192)

    print("KERNEL_OK")
</pallas_src>

<mosaic_0001>
module attributes {stable_mosaic.version = 11 : i64} {
  func.func @_pool_kernel(%arg0: i32, %arg1: i32, %arg2: memref<8x256xbf16, #tpu.memory_space<vmem>>, %arg3: memref<8x1xf32, #tpu.memory_space<vmem>>, %arg4: memref<8x1xf32, #tpu.memory_space<vmem>>) attributes {dimension_semantics = [#tpu.dimension_semantics<parallel>, #tpu.dimension_semantics<arbitrary>], iteration_bounds = array<i64: 1, 1>, scalar_prefetch = 0 : i64, scratch_operands = 0 : i64, tpu.core_type = #tpu.core_type<tc>, window_params = [{transform_indices = @transform_0, window_bounds = array<i64: 8, 256>}, {transform_indices = @transform_1, window_bounds = array<i64: 8, 1>}, {transform_indices = @transform_2, window_bounds = array<i64: 8, 1>}]} {
    %c0_i32 = arith.constant 0 : i32
    %0 = arith.cmpi eq, %arg1, %c0_i32 : i32
    %1 = arith.extui %0 : i1 to i32
    %c0_i32_0 = arith.constant 0 : i32
    %2 = arith.cmpi ne, %1, %c0_i32_0 : i32
    scf.if %2 {
      %cst_11 = arith.constant 0xFF800000 : f32
      %16 = vector.broadcast %cst_11 : f32 to vector<8x1xf32>
      %c0_12 = arith.constant 0 : index
      %c0_13 = arith.constant 0 : index
      %17 = vector.load %arg3[%c0_12, %c0_13] : memref<8x1xf32, #tpu.memory_space<vmem>>, vector<8x1xf32>
      tpu.vector_store %arg3[%c0_12, %c0_13], %16 {strides = array<i32>} : memref<8x1xf32, #tpu.memory_space<vmem>>, vector<8x1xf32>,
      %cst_14 = arith.constant 0.000000e+00 : f32
      %18 = vector.broadcast %cst_14 : f32 to vector<8x1xf32>
      %c0_15 = arith.constant 0 : index
      %c0_16 = arith.constant 0 : index
      %19 = vector.load %arg4[%c0_15, %c0_16] : memref<8x1xf32, #tpu.memory_space<vmem>>, vector<8x1xf32>
      tpu.vector_store %arg4[%c0_15, %c0_16], %18 {strides = array<i32>} : memref<8x1xf32, #tpu.memory_space<vmem>>, vector<8x1xf32>,
    } else {
    }
    %c0 = arith.constant 0 : index
    %c0_1 = arith.constant 0 : index
    %3 = vector.load %arg2[%c0, %c0_1] : memref<8x256xbf16, #tpu.memory_space<vmem>>, vector<8x256xbf16>
    %cst = arith.constant dense<0xFF80> : vector<8xbf16>
    %4 = vector.multi_reduction <maximumf>, %3, %cst [1] : vector<8x256xbf16> to vector<8xbf16>
    %5 = vector.shape_cast %4 : vector<8xbf16> to vector<8x1xbf16>
    %6 = arith.extf %5 : vector<8x1xbf16> to vector<8x1xf32>
    %7 = arith.extf %3 : vector<8x256xbf16> to vector<8x256xf32>
    %cst_2 = arith.constant dense<0.000000e+00> : vector<8xf32>
    %8 = vector.multi_reduction <add>, %7, %cst_2 [1] : vector<8x256xf32> to vector<8xf32>
    %9 = vector.shape_cast %8 : vector<8xf32> to vector<8x1xf32>
    %c0_3 = arith.constant 0 : index
    %c0_4 = arith.constant 0 : index
    %10 = vector.load %arg3[%c0_3, %c0_4] : memref<8x1xf32, #tpu.memory_space<vmem>>, vector<8x1xf32>
    %11 = arith.maximumf %10, %6 : vector<8x1xf32>
    %c0_5 = arith.constant 0 : index
    %c0_6 = arith.constant 0 : index
    %12 = vector.load %arg3[%c0_5, %c0_6] : memref<8x1xf32, #tpu.memory_space<vmem>>, vector<8x1xf32>
    tpu.vector_store %arg3[%c0_5, %c0_6], %11 {strides = array<i32>} : memref<8x1xf32, #tpu.memory_space<vmem>>, vector<8x1xf32>,
    %c0_7 = arith.constant 0 : index
    %c0_8 = arith.constant 0 : index
    %13 = vector.load %arg4[%c0_7, %c0_8] : memref<8x1xf32, #tpu.memory_space<vmem>>, vector<8x1xf32>
    %14 = arith.addf %13, %9 : vector<8x1xf32>
    %c0_9 = arith.constant 0 : index
    %c0_10 = arith.constant 0 : index
    %15 = vector.load %arg4[%c0_9, %c0_10] : memref<8x1xf32, #tpu.memory_space<vmem>>, vector<8x1xf32>
    tpu.vector_store %arg4[%c0_9, %c0_10], %14 {strides = array<i32>} : memref<8x1xf32, #tpu.memory_space<vmem>>, vector<8x1xf32>,
    return
  }
  func.func @transform_0(%arg0: i32, %arg1: i32) -> (i32, i32) {
    %c0_i32 = arith.constant 0 : i32
    return %arg0, %arg1 : i32, i32
  }
  func.func @transform_1(%arg0: i32, %arg1: i32) -> (i32, i32) {
    %c0_i32 = arith.constant 0 : i32
    %c0_i32_0 = arith.constant 0 : i32
    return %arg0, %c0_i32 : i32, i32
  }
  func.func @transform_2(%arg0: i32, %arg1: i32) -> (i32, i32) {
    %c0_i32 = arith.constant 0 : i32
    %c0_i32_0 = arith.constant 0 : i32
    return %arg0, %c0_i32 : i32, i32
  }
}

</mosaic_0001>

<bundles_post_ra>
// kernel: tpu_custom_call.1
= control target key start
LH: loop header
LB: loop body
LE: loop exit
PB: predicated region body
PF: predicated region fallthrough
CT: control target
= control target key end

     0   :  { %8 = vsyncpa [#allocation3], 0  ;;  %s100_s9 = smov [#allocation2]   ;;  %s152_s0 = inlined_call_operand.hbm [shape: bf16[8,256], index: 0, kind: input, shape index: {}]   ;;  %s153_s1 = inlined_call_operand.vmem [shape: f32[8,1], index: 1, kind: output, shape index: {0}]   ;;  %s154_s2 = inlined_call_operand.vmem [shape: f32[8,1], index: 2, kind: output, shape index: {1}]  }
   0x1   :  { %s15_s10 = sshll.u32 %s100_s9, 4  ;;  %s76_s13 = scalar_lea.hbm %s152_s0, 128  ;;  %s16_s10 = int_to_ptr.vmem [resolvable:$true] %s15_s10 }
   0x2   :  { %p77_p0 = scmp.ne.s32.totalorder %s152_s0, %s76_s13  ;;  %p80_p1 = scmp.lt.u32.totalorder %s76_s13, %s152_s0 }
   0x4   :  { %p82_p2 = pnand %p80_p1, %p77_p0 }
   0x6   :  { %85 = shalt.err (!%p82_p2)
}
   0x7   :  { %s86_s18 = scalar_lea.vmem %s16_s10, 128  ;;  %p91_p4 = scmp.lt.s32.totalorder %s16_s10, %s16_s10 }
   0x8   :  { %p87_p3 = scmp.ne.s32.totalorder %s16_s10, %s86_s18  ;;  %p92_p5 = scmp.lt.s32.totalorder %s86_s18, %s86_s18 }
   0xa   :  { %p93_p6 = por %p92_p5, %p91_p4 }
   0xc   :  { %p94_p7 = pnand %p93_p6, %p87_p3 }
   0xe   :  { %97 = shalt.err (!%p94_p7)
}
   0xf   :  { %18 = dma.hbm_to_vmem [thread:$0]  %s152_s0, 128, %s16_s10, [#allocation3]  }
  0x10   :  { %98 = dma.done.wait [#allocation3], 128  }
  0x11   :  { %99 = vsyncadd [#allocation3], 4294967168  ;;  %vm27_vm0 = vcmask 7168   ;;  %v101_v0 = vmov -inf   ;;  %v102_v1 = vmov 0.0   ;;  %v30_v2 = vld [vmem:[#allocation2] sm:$0xff] }
  0x12   :  { %28 = vst.msk [vmem:[%s153_s1] sm:$0xff] %vm27_vm0, %v101_v0  ;;  %29 = vst.msk [vmem:[%s154_s2] sm:$0xff] %vm27_vm0, %v102_v1  ;;  %vm36_vm1 = vcmask 1043456   ;;  %v69_v3 = vcombine.low %v30_v2, %v30_v2  ;;  %v70_v4 = vcombine.high %v30_v2, %v30_v2  ;;  %v48_v8 = vunpack.c.l.bf16 %v30_v2 }
  0x13   :  { %v49_v9 = vunpack.c.h.bf16 %v30_v2 }
  0x14   :  { %v39_v5 = vsel %vm36_vm1, %v69_v3, 4286644096  ;;  %v42_v6 = vsel %vm36_vm1, %v70_v4, 4286644096 }
  0x15   :  { %v44_v7 = vmax.bf16 %v42_v6, %v39_v5  ;;  %v50_v10 = vadd.f32 %v49_v9, %v48_v8 }
  0x17   :  { %45 = vmax.xlane.bf16.xlu0 %v44_v7 }
  0x19   :  { %v53_v12 = vld [vmem:[%s153_s1] sm:$0xff] }
  0x1a   :  { %v57_v14 = vld [vmem:[%s154_s2] sm:$0xff] }
  0x1f   :  { %51 = vadd.xlane.f32.xlu0 %v50_v10 }
  0xa8   :  { %v46_v11 = vpop.xlane.xlu0 %45 }
  0xa9   :  { %v47_v13 = vunpack.c.l.bf16 %v46_v11 }
  0xab   :  { %v54_v15 = vmax.f32 %v53_v12, %v47_v13 }
  0xac   :  { %v52_v16 = vpop.xlane.xlu0 %51 }
  0xad   :  { %56 = vst.msk [vmem:[%s153_s1] sm:$0xff] %vm27_vm0, %v54_v15  ;;  %v58_v17 = vadd.f32 %v57_v14, %v52_v16 }
  0xaf   :  { %59 = vst.msk [vmem:[%s154_s2] sm:$0xff] %vm27_vm0, %v58_v17 }
  0xb0   :  { %68 = vsyncpa [#allocation3], 1 }

</bundles_post_ra>
